<compile_context>
chip_gen: v7x
topology: tpu7x:2x2x1
jax: 0.10.0
libtpu: 0.0.40
codegen_flags: <defaults>
</compile_context>

<pallas_src>
import functools
import math

import jax
import jax.numpy as jnp
from jax import lax
from jax.experimental import pallas as pl
from jax.experimental.pallas import tpu as pltpu

_EPS = 1e-8                      # F.cosine_similarity default eps
_EPS_SQ = _EPS * _EPS            # clamp applied to the squared norms
_LANES = 128
_MAX_TILE_ROWS = 8192            # cap on packed rows per grid step
# DEFAULT = one bf16 MXU pass (exact 0/1 RHS, f32 accumulate).  Use
# lax.Precision.HIGH if very large / ill-conditioned features miss tolerance.
_DOT_PRECISION = lax.Precision.DEFAULT


def _round_up(x, m):
    return ((x + m - 1) // m) * m


def _cos_loss_kernel(x_ref, y_ref, out_ref, *, d, k, rp, tile_rp,
                     tiles_per_chunk, need_mask, l1):
    """One (tile_rp, k*d) block of lane-packed rows -> partial sum of g(cos).

    out_ref is a tiny (8, 128) resident per-chunk accumulator; only
    out_ref[0, :k] is ever non-zero.
    """
    @pl.when(pl.program_id(1) == 0)
    def _init():
        out_ref[...] = jnp.zeros_like(out_ref)

    x = x_ref[...].astype(jnp.float32)          # (tile_rp, k*d), lane-dense
    y = y_ref[...].astype(jnp.float32)

    # 0/1 segment selector built in-vreg (no HBM input): sel[j, c] = 1 iff
    # lane j belongs to packed segment c (comparisons only, no integer div).
    kd = k * d
    j_id = lax.broadcasted_iota(jnp.int32, (kd, k), 0)
    c_id = lax.broadcasted_iota(jnp.int32, (kd, k), 1)
    lo = c_id * d
    sel = ((j_id >= lo) & (j_id < lo + d)).astype(jnp.float32)

    # Per-row segmented reductions over the feature axis on the MXU:
    # (tile_rp, k*d) @ (k*d, k) -> (tile_rp, k), one column per packed row.
    sxy = jnp.dot(x * y, sel, preferred_element_type=jnp.float32,
                  precision=_DOT_PRECISION)
    sxx = jnp.dot(x * x, sel, preferred_element_type=jnp.float32,
                  precision=_DOT_PRECISION)
    syy = jnp.dot(y * y, sel, preferred_element_type=jnp.float32,
                  precision=_DOT_PRECISION)

    # cos = <x,y> / (max(||x||,eps) * max(||y||,eps)), per-norm clamp as in
    # F.cosine_similarity, with a single rsqrt on the EUP.
    inv = lax.rsqrt(jnp.maximum(sxx, _EPS_SQ) * jnp.maximum(syy, _EPS_SQ))
    cos = sxy * inv
    val = jnp.abs(cos) if l1 else jnp.square(cos)          # (tile_rp, k)

    if need_mask:
        # Zero out rows of a ragged / duplicated final tile that lie past rp.
        blk = pl.program_id(0) * tiles_per_chunk + pl.program_id(1)
        rid = blk * tile_rp + lax.broadcasted_iota(jnp.int32, (tile_rp, k), 0)
        val = jnp.where(rid < rp, val, 0.0)

    # Reduce this tile's contribution once and add it to the tiny resident
    # accumulator (replaces the old (tile_rp, k) per-step read-modify-write).
    partial = jnp.sum(val, axis=0, keepdims=True)           # (1, k)
    out_ref[0:1, 0:k] += partial


def _vmem_limit_bytes():
    try:
        cap = int(pltpu.get_tpu_info().vmem_capacity_bytes)
    except Exception:
        cap = 64 * 1024 * 1024          # conservative fallback (v7x per-TC)
    # Half the physical capacity, floored at 32 MiB, capped at 64 MiB.
    return max(32 * 1024 * 1024, min(cap // 2, 64 * 1024 * 1024))


def _pair_loss_sum(x, y, d, k, l1):
    """sum_r g(cos_r) over the lane-packed rows (rp, k*d) of one feature pair."""
    rp, kd = x.shape
    itemsize = jnp.dtype(x.dtype).itemsize
    vmem_limit = _vmem_limit_bytes()

    # Per packed row: double-buffered x & y blocks (input dtype) plus ~8
    # f32-width in-kernel temporaries (casts, products, k-wide intermediates).
    per_row_bytes = kd * (4 * itemsize + 8 * 4)
    max_rows = max(8, (vmem_limit // per_row_bytes) // 8 * 8)
    tile_rp = min(_MAX_TILE_ROWS, max_rows, _round_up(rp, 8))

    total_tiles = pl.cdiv(rp, tile_rp)
    # Two "parallel" chunks (v7x megacore) only when the split is ~free on
    # single-TC chips (even tile count, or enough tiles that one duplicated
    # overhang tile is negligible).
    n_chunks = 2 if (total_tiles >= 2 and
                     (total_tiles % 2 == 0 or total_tiles >= 8)) else 1
    tiles_per_chunk = pl.cdiv(total_tiles, n_chunks)
    need_mask = (n_chunks * tiles_per_chunk * tile_rp) != rp

    def row_map(c, i):
        # Clamp so a (rare) overhanging grid step re-reads the last valid
        # tile; its rows are zeroed by the in-kernel mask.
        return (jnp.minimum(c * tiles_per_chunk + i, total_tiles - 1), 0)

    kernel = functools.partial(
        _cos_loss_kernel, d=d, k=k, rp=rp, tile_rp=tile_rp,
        tiles_per_chunk=tiles_per_chunk, need_mask=need_mask, l1=l1)

    out = pl.pallas_call(
        kernel,
        out_shape=jax.ShapeDtypeStruct((n_chunks * 8, _LANES), jnp.float32),
        grid=(n_chunks, tiles_per_chunk),
        in_specs=[pl.BlockSpec((tile_rp, kd), row_map),
                  pl.BlockSpec((tile_rp, kd), row_map)],
        out_specs=pl.BlockSpec((8, _LANES), lambda c, i: (c, 0)),
        compiler_params=pltpu.CompilerParams(
            dimension_semantics=("parallel", "arbitrary"),
            vmem_limit_bytes=int(vmem_limit)),
    )(x, y)
    return jnp.sum(out)       # tiny wrapper-side collapse of the partial sums


def _pack_params(d):
    """Lane-dense packing: k rows of (zero-padded) width dp share 128 lanes."""
    if d >= _LANES:
        return _round_up(d, _LANES), 1
    dp = pl.next_power_of_2(d)            # divisor of 128
    return dp, _LANES // dp


def _pack_rows(f, dp, k, rows_target):
    """Flatten to rows and lane-pack k rows per 128-lane packed row.

    The reshape to (rows_target//k, k*dp) is contiguous and free; jnp.pad (an
    HBM copy) is only taken when the feature dim is not lane-friendly or the
    row count does not pack evenly (zeros change neither dots nor norms)."""
    d = f.shape[-1]
    x = f.reshape(-1, d)
    if dp != d:
        x = jnp.pad(x, ((0, 0), (0, dp - d)))
    if rows_target != x.shape[0]:
        x = jnp.pad(x, ((0, rows_target - x.shape[0]), (0, 0)))
    return x.reshape(rows_target // k, k * dp)


def orthogonal_loss(features1, features2, l1=False):
    assert len(features1) == len(features2) and len(features1) > 0
    per_pair = []
    for f1, f2 in zip(features1, features2):
        assert f1.shape[-1] == f2.shape[-1]
        if f1.shape != f2.shape:
            f1, f2 = jnp.broadcast_arrays(f1, f2)
        d = int(f1.shape[-1])
        r = int(math.prod(f1.shape[:-1]))
        dp, k = _pack_params(d)
        rows_target = _round_up(max(r, 1), k)
        if rows_target // k < 8:          # tiny pairs: fill one sublane block
            rows_target = 8 * k
        x = _pack_rows(f1, dp, k, rows_target)
        y = _pack_rows(f2, dp, k, rows_target)
        pair_sum = _pair_loss_sum(x, y, dp, k, l1)
        # Padded rows contribute 0, so dividing by the true row count gives the
        # per-pair mean.  (r == 0 would be NaN in torch; we return 0 instead.)
        per_pair.append(pair_sum / jnp.float32(max(r, 1)))
    return jnp.mean(jnp.stack(per_pair))


def _reference_loss(features1, features2, l1=False):
    vals = []
    for f1, f2 in zip(features1, features2):
        f1 = f1.astype(jnp.float32)
        f2 = f2.astype(jnp.float32)
        dot = jnp.sum(f1 * f2, axis=-1)
        n1 = jnp.maximum(jnp.linalg.norm(f1, axis=-1), _EPS)
        n2 = jnp.maximum(jnp.linalg.norm(f2, axis=-1), _EPS)
        cos = dot / (n1 * n2)
        vals.append(jnp.mean(jnp.abs(cos)) if l1 else jnp.mean(jnp.square(cos)))
    return jnp.mean(jnp.stack(vals))


if __name__ == "__main__":
    key = jax.random.PRNGKey(0)
    k1, k2, k3, k4 = jax.random.split(key, 4)

    # Two feature pairs, e.g. intermediate features of shape (batch, seq, hidden).
    features1 = [
        jax.random.normal(k1, (2, 16, 32), dtype=jnp.float32),
        jax.random.normal(k2, (2, 8, 32), dtype=jnp.float32),
    ]
    features2 = [
        jax.random.normal(k3, (2, 16, 32), dtype=jnp.float32),
        jax.random.normal(k4, (2, 8, 32), dtype=jnp.float32),
    ]

    loss_sq = orthogonal_loss(features1, features2, l1=False)
    loss_l1 = orthogonal_loss(features1, features2, l1=True)
    jax.block_until_ready((loss_sq, loss_l1))

    ref_sq = _reference_loss(features1, features2, l1=False)
    ref_l1 = _reference_loss(features1, features2, l1=True)
    assert jnp.allclose(loss_sq, ref_sq, rtol=2e-3, atol=2e-4), (loss_sq, ref_sq)
    assert jnp.allclose(loss_l1, ref_l1, rtol=2e-3, atol=2e-4), (loss_l1, ref_l1)

    print("KERNEL_OK")
</pallas_src>

<mosaic_0001>
module attributes {stable_mosaic.version = 11 : i64} {
  func.func @_cos_loss_kernel(%arg0: i32, %arg1: i32, %arg2: memref<8x128xf32, #tpu.memory_space<vmem>>, %arg3: memref<8x128xf32, #tpu.memory_space<vmem>>, %arg4: memref<8x128xf32, #tpu.memory_space<vmem>>) attributes {dimension_semantics = [#tpu.dimension_semantics<parallel>, #tpu.dimension_semantics<arbitrary>], iteration_bounds = array<i64: 1, 1>, scalar_prefetch = 0 : i64, scratch_operands = 0 : i64, tpu.core_type = #tpu.core_type<tc>, window_params = [{transform_indices = @transform_0, window_bounds = array<i64: 8, 128>}, {transform_indices = @transform_1, window_bounds = array<i64: 8, 128>}, {transform_indices = @transform_2, window_bounds = array<i64: 8, 128>}]} {
    %c0_i32 = arith.constant 0 : i32
    %0 = arith.cmpi eq, %arg1, %c0_i32 : i32
    %1 = arith.extui %0 : i1 to i32
    %c0_i32_0 = arith.constant 0 : i32
    %2 = arith.cmpi ne, %1, %c0_i32_0 : i32
    scf.if %2 {
      %cst_14 = arith.constant 0.000000e+00 : f32
      %35 = vector.broadcast %cst_14 : f32 to vector<8x128xf32>
      %c0_15 = arith.constant 0 : index
      %c0_16 = arith.constant 0 : index
      %36 = vector.load %arg4[%c0_15, %c0_16] : memref<8x128xf32, #tpu.memory_space<vmem>>, vector<8x128xf32>
      tpu.vector_store %arg4[%c0_15, %c0_16], %35 {strides = array<i32>} : memref<8x128xf32, #tpu.memory_space<vmem>>, vector<8x128xf32>,
    } else {
    }
    %c0 = arith.constant 0 : index
    %c0_1 = arith.constant 0 : index
    %3 = vector.load %arg2[%c0, %c0_1] : memref<8x128xf32, #tpu.memory_space<vmem>>, vector<8x128xf32>
    %c0_2 = arith.constant 0 : index
    %c0_3 = arith.constant 0 : index
    %4 = vector.load %arg3[%c0_2, %c0_3] : memref<8x128xf32, #tpu.memory_space<vmem>>, vector<8x128xf32>
    %5 = tpu.iota {dimensions = array<i32: 0>} : vector<128x4xi32>
    %6 = tpu.iota {dimensions = array<i32: 1>} : vector<128x4xi32>
    %c32_i32 = arith.constant 32 : i32
    %7 = vector.broadcast %c32_i32 : i32 to vector<128x4xi32>
    %8 = arith.muli %6, %7 : vector<128x4xi32>
    %9 = arith.cmpi sge, %5, %8 : vector<128x4xi32>
    %c32_i32_4 = arith.constant 32 : i32
    %10 = vector.broadcast %c32_i32_4 : i32 to vector<128x4xi32>
    %11 = arith.addi %8, %10 : vector<128x4xi32>
    %12 = arith.cmpi slt, %5, %11 : vector<128x4xi32>
    %13 = arith.andi %9, %12 : vector<128x4xi1>
    %14 = arith.extui %13 : vector<128x4xi1> to vector<128x4xi32>
    %15 = arith.sitofp %14 : vector<128x4xi32> to vector<128x4xf32>
    %16 = arith.mulf %3, %4 : vector<8x128xf32>
    %cst = arith.constant dense<0.000000e+00> : vector<8x4xf32>
    %17 = tpu.matmul %16, %15, %cst {dimension_numbers = #tpu.dot_dimension_numbers<[1], [0], [0], [1], [0, 0, 1, 1], [], []>} : vector<8x128xf32>, vector<128x4xf32>, vector<8x4xf32> -> vector<8x4xf32>
    %18 = arith.mulf %3, %3 : vector<8x128xf32>
    %cst_5 = arith.constant dense<0.000000e+00> : vector<8x4xf32>
    %19 = tpu.matmul %18, %15, %cst_5 {dimension_numbers = #tpu.dot_dimension_numbers<[1], [0], [0], [1], [0, 0, 1, 1], [], []>} : vector<8x128xf32>, vector<128x4xf32>, vector<8x4xf32> -> vector<8x4xf32>
    %20 = arith.mulf %4, %4 : vector<8x128xf32>
    %cst_6 = arith.constant dense<0.000000e+00> : vector<8x4xf32>
    %21 = tpu.matmul %20, %15, %cst_6 {dimension_numbers = #tpu.dot_dimension_numbers<[1], [0], [0], [1], [0, 0, 1, 1], [], []>} : vector<8x128xf32>, vector<128x4xf32>, vector<8x4xf32> -> vector<8x4xf32>
    %cst_7 = arith.constant 1.000000e-16 : f32
    %22 = vector.broadcast %cst_7 : f32 to vector<8x4xf32>
    %23 = arith.maximumf %19, %22 : vector<8x4xf32>
    %cst_8 = arith.constant 1.000000e-16 : f32
    %24 = vector.broadcast %cst_8 : f32 to vector<8x4xf32>
    %25 = arith.maximumf %21, %24 : vector<8x4xf32>
    %26 = arith.mulf %23, %25 : vector<8x4xf32>
    %27 = math.rsqrt %26 : vector<8x4xf32>
    %28 = arith.mulf %17, %27 : vector<8x4xf32>
    %29 = arith.mulf %28, %28 : vector<8x4xf32>
    %cst_9 = arith.constant dense<0.000000e+00> : vector<4xf32>
    %30 = vector.multi_reduction <add>, %29, %cst_9 [0] : vector<8x4xf32> to vector<4xf32>
    %31 = vector.shape_cast %30 : vector<4xf32> to vector<1x4xf32>
    %c0_10 = arith.constant 0 : index
    %c0_11 = arith.constant 0 : index
    %32 = vector.load %arg4[%c0_10, %c0_11] : memref<8x128xf32, #tpu.memory_space<vmem>>, vector<1x4xf32>
    %33 = arith.addf %32, %31 : vector<1x4xf32>
    %c0_12 = arith.constant 0 : index
    %c0_13 = arith.constant 0 : index
    %34 = vector.load %arg4[%c0_12, %c0_13] : memref<8x128xf32, #tpu.memory_space<vmem>>, vector<1x4xf32>
    tpu.vector_store %arg4[%c0_12, %c0_13], %33 {strides = array<i32>} : memref<8x128xf32, #tpu.memory_space<vmem>>, vector<1x4xf32>,
    return
  }
  func.func @transform_0(%arg0: i32, %arg1: i32) -> (i32, i32) {
    %c1_i32 = arith.constant 1 : i32
    %0 = arith.muli %arg0, %c1_i32 : i32
    %1 = arith.addi %0, %arg1 : i32
    %c0_i32 = arith.constant 0 : i32
    %2 = arith.minsi %1, %c0_i32 : i32
    %c0_i32_0 = arith.constant 0 : i32
    %c0_i32_1 = arith.constant 0 : i32
    return %2, %c0_i32_0 : i32, i32
  }
  func.func @transform_1(%arg0: i32, %arg1: i32) -> (i32, i32) {
    %c1_i32 = arith.constant 1 : i32
    %0 = arith.muli %arg0, %c1_i32 : i32
    %1 = arith.addi %0, %arg1 : i32
    %c0_i32 = arith.constant 0 : i32
    %2 = arith.minsi %1, %c0_i32 : i32
    %c0_i32_0 = arith.constant 0 : i32
    %c0_i32_1 = arith.constant 0 : i32
    return %2, %c0_i32_0 : i32, i32
  }
  func.func @transform_2(%arg0: i32, %arg1: i32) -> (i32, i32) {
    %c0_i32 = arith.constant 0 : i32
    %c0_i32_0 = arith.constant 0 : i32
    return %arg0, %c0_i32 : i32, i32
  }
}

</mosaic_0001>

<bundles_post_ra>
// kernel: tpu_custom_call.1
= control target key start
LH: loop header
LB: loop body
LE: loop exit
PB: predicated region body
PF: predicated region fallthrough
CT: control target
= control target key end

     0   :  { %7 = vsyncpa [#allocation3], 0  ;;  %s1033_s0 = inlined_call_operand.hbm [shape: f32[8,128], index: 0, kind: input, shape index: {}]   ;;  %s1034_s1 = inlined_call_operand.hbm [shape: f32[8,128], index: 1, kind: input, shape index: {}]   ;;  %s1035_s2 = inlined_call_operand.hbm [shape: f32[8,128], index: 2, kind: output, shape index: {}]  }
   0x1   :  { %8 = vsyncpa [#allocation6], 0 }
   0x2   :  { %9 = vsyncpa [#allocation4], 0  ;;  %s784_s9 = smov [#allocation2]   ;;  %s785_s11 = smov [#allocation5]  }
   0x3   :  { %s21_s10 = sshll.u32 %s784_s9, 4  ;;  %s36_s12 = sshll.u32 %s785_s11, 4  ;;  %s22_s10 = int_to_ptr.vmem [resolvable:$true] %s21_s10  ;;  %s37_s12 = int_to_ptr.vmem [resolvable:$true] %s36_s12 }
   0x4   :  { %s712_s15 = scalar_lea.hbm %s1033_s0, 128 }
   0x5   :  { %p713_p0 = scmp.ne.s32.totalorder %s1033_s0, %s712_s15  ;;  %p716_p1 = scmp.lt.u32.totalorder %s712_s15, %s1033_s0 }
   0x7   :  { %p718_p2 = pnand %p716_p1, %p713_p0 }
   0x9   :  { %721 = shalt.err (!%p718_p2)
}
   0xa   :  { %s722_s20 = scalar_lea.vmem %s22_s10, 128  ;;  %p727_p4 = scmp.lt.s32.totalorder %s22_s10, %s22_s10 }
   0xb   :  { %p723_p3 = scmp.ne.s32.totalorder %s22_s10, %s722_s20  ;;  %p728_p5 = scmp.lt.s32.totalorder %s722_s20, %s722_s20 }
   0xd   :  { %p729_p6 = por %p728_p5, %p727_p4 }
   0xf   :  { %p730_p7 = pnand %p729_p6, %p723_p3 }
  0x11   :  { %733 = shalt.err (!%p730_p7)
}
  0x12   :  { %24 = dma.hbm_to_vmem [thread:$0]  %s1033_s0, 128, %s22_s10, [#allocation3]  }
  0x13   :  { %s734_s25 = scalar_lea.hbm %s1034_s1, 128 }
  0x14   :  { %p735_p8 = scmp.ne.s32.totalorder %s1034_s1, %s734_s25  ;;  %p738_p9 = scmp.lt.u32.totalorder %s734_s25, %s1034_s1 }
  0x16   :  { %p740_p10 = pnand %p738_p9, %p735_p8 }
  0x18   :  { %743 = shalt.err (!%p740_p10)
}
  0x19   :  { %s744_s30 = scalar_lea.vmem %s37_s12, 128  ;;  %p749_p12 = scmp.lt.s32.totalorder %s37_s12, %s37_s12 }
  0x1a   :  { %p745_p11 = scmp.ne.s32.totalorder %s37_s12, %s744_s30  ;;  %p750_p13 = scmp.lt.s32.totalorder %s744_s30, %s744_s30 }
  0x1c   :  { %p751_p0 = por %p750_p13, %p749_p12 }
  0x1e   :  { %p752_p1 = pnand %p751_p0, %p745_p11 }
  0x20   :  { %755 = shalt.err (!%p752_p1)
}
  0x21   :  { %39 = dma.hbm_to_vmem [thread:$0]  %s1034_s1, 128, %s37_s12, [#allocation6]  }
  0x22   :  { %778 = dma.done.wait [#allocation3], 128  }
  0x23   :  { %779 = vsyncadd [#allocation3], 4294967168  ;;  %v59_v0 = vlaneseq }
  0x24   :  { %780 = dma.done.wait [#allocation6], 128  }
  0x25   :  { %781 = vsyncadd [#allocation6], 4294967168  ;;  %v786_v1 = vmov 0.0|0.0   ;;  %v787_v2 = vmov 0.0   ;;  %v833_v3 = vshrl.u32 %v59_v0, 7  ;;  %v77_v4 = vand.u32 127, %v59_v0 }
  0x26   :  { %631 = vmatprep.subr.bf16.mxu0 %v786_v1  ;;  %56 = vst [vmem:[#allocation7] sm:$0xff] %v787_v2  ;;  %655 = vmatprep.subr.bf16.mxu1 %v786_v1  ;;  %vm1036_vm0 = vmmov 0   ;;  %v789_v14 = vmov 1.0|1.0   ;;  %v57_v30 = vld [vmem:[#allocation2] sm:$0xff]  ;;  %v58_v31 = vld [vmem:[#allocation5] sm:$0xff] }
  0x27   :  { %558 = vmatprep.mubr.msk.f32.mxu0 %vm1036_vm0, %v787_v2  ;;  %593 = vmatprep.mubr.msk.f32.mxu1 %vm1036_vm0, %v787_v2  ;;  %v61_v5 = vadd.s32 8, %v833_v3  ;;  %v840_v6 = vmul.u32 32, %v77_v4  ;;  %v62_v7 = vadd.s32 16, %v833_v3  ;;  %v63_v9 = vadd.s32 24, %v833_v3  ;;  %s790_s1 = smov [#allocation7]  }
  0x28   :  { %v64_v10 = vadd.s32 32, %v833_v3  ;;  %v65_v11 = vadd.s32 40, %v833_v3  ;;  %v66_v13 = vadd.s32 48, %v833_v3  ;;  %v67_v15 = vadd.s32 56, %v833_v3  ;;  %s397_s4 = sshll.u32 %s790_s1, 4  ;;  %s398_s4 = int_to_ptr.vmem [resolvable:$true] %s397_s4 }
  0x29   :  { %vm79_vm1 = vcmp.ge.s32.totalorder %v833_v3, %v840_v6  ;;  %v846_v8 = vadd.s32 32, %v840_v6  ;;  %vm80_vm2 = vcmp.ge.s32.totalorder %v61_v5, %v840_v6  ;;  %vm81_vm6 = vcmp.ge.s32.totalorder %v62_v7, %v840_v6  ;;  %s756_s5 = scalar_lea.vmem %s398_s4, 128  ;;  %p761_p3 = scmp.lt.s32.totalorder %s398_s4, %s398_s4 }
  0x2a   :  { %vm82_vm9 = vcmp.ge.s32.totalorder %v63_v9, %v840_v6  ;;  %vm83_vm13 = vcmp.ge.s32.totalorder %v64_v10, %v840_v6  ;;  %v68_v17 = vadd.s32 64, %v833_v3  ;;  %v69_v18 = vadd.s32 72, %v833_v3  ;;  %p757_p2 = scmp.ne.s32.totalorder %s398_s4, %s756_s5  ;;  %p762_p4 = scmp.lt.s32.totalorder %s756_s5, %s756_s5 }
  0x2b   :  { %vm96_vm3 = vcmp.lt.s32.totalorder %v833_v3, %v846_v8  ;;  %vm97_vm4 = vcmp.lt.s32.totalorder %v61_v5, %v846_v8  ;;  %vm98_vm7 = vcmp.lt.s32.totalorder %v62_v7, %v846_v8  ;;  %vm99_vm10 = vcmp.lt.s32.totalorder %v63_v9, %v846_v8 }
  0x2c   :  { %vm112_vm5 = vmand %vm79_vm1, %vm96_vm3  ;;  %vm100_vm14 = vcmp.lt.s32.totalorder %v64_v10, %v846_v8  ;;  %vm84_vm1 = vcmp.ge.s32.totalorder %v65_v11, %v840_v6  ;;  %v70_v20 = vadd.s32 80, %v833_v3  ;;  %v71_v21 = vadd.s32 88, %v833_v3  ;;  %p763_p5 = por %p762_p4, %p761_p3 }
  0x2d   :  { %vm113_vm8 = vmand %vm80_vm2, %vm97_vm4  ;;  %vm101_vm2 = vcmp.lt.s32.totalorder %v65_v11, %v846_v8  ;;  %v72_v23 = vadd.s32 96, %v833_v3  ;;  %v73_v24 = vadd.s32 104, %v833_v3  ;;  %v74_v26 = vadd.s32 112, %v833_v3  ;;  %v387_v54 = vld [vmem:[#allocation7] sm:$0x1] }
  0x2e   :  { %vm859_vm11 = vmpackc.low %vm113_vm8, %vm112_vm5  ;;  %vm85_vm5 = vcmp.ge.s32.totalorder %v66_v13, %v840_v6  ;;  %vm86_vm8 = vcmp.ge.s32.totalorder %v67_v15, %v840_v6  ;;  %vm107_vm0 = vcmp.lt.s32.totalorder %v71_v21, %v846_v8  ;;  %v75_v28 = vadd.s32 120, %v833_v3  ;;  %p764_p6 = pnand %p763_p5, %p757_p2 }
  0x2f   :  { %633 = vmatpush3.bf16.msk.msra.mxu0 %vm859_vm11, %v789_v14  ;;  %vm114_vm12 = vmand %vm81_vm6, %vm98_vm7  ;;  %657 = vmatpush3.bf16.msk.msra.mxu1 %vm859_vm11, %v789_v14  ;;  %vm102_vm6 = vcmp.lt.s32.totalorder %v66_v13, %v846_v8  ;;  %v160_v33 = vmul.f32 %v58_v31, %v57_v30  ;;  %v231_v34 = vmul.f32 %v57_v30, %v57_v30 }
  0x30   :  { %634 = vmatprep.subr.bf16.mxu0 %v786_v1  ;;  %vm115_vm15 = vmand %vm82_vm9, %vm99_vm10  ;;  %658 = vmatprep.subr.bf16.mxu1 %v786_v1  ;;  %vm103_vm9 = vcmp.lt.s32.totalorder %v67_v15, %v846_v8  ;;  %v302_v35 = vmul.f32 %v58_v31, %v58_v31 }
  0x31   :  { %vm873_vm3 = vmpackc.low %vm115_vm15, %vm114_vm12 }
  0x32   :  { %vm116_vm4 = vmand %vm83_vm13, %vm100_vm14  ;;  %vm87_vm13 = vcmp.ge.s32.totalorder %v68_v17, %v840_v6  ;;  %vm104_vm14 = vcmp.lt.s32.totalorder %v68_v17, %v846_v8 }
  0x33   :  { %636 = vmatpush3.bf16.msk.msra.mxu0 %vm873_vm3, %v789_v14  ;;  %vm117_vm7 = vmand %vm84_vm1, %vm101_vm2  ;;  %660 = vmatpush3.bf16.msk.msra.mxu1 %vm873_vm3, %v789_v14  ;;  %vm88_vm1 = vcmp.ge.s32.totalorder %v69_v18, %v840_v6  ;;  %vm105_vm2 = vcmp.lt.s32.totalorder %v69_v18, %v846_v8 }
  0x34   :  { %637 = vmatprep.subr.bf16.mxu0 %v786_v1  ;;  %vm891_vm10 = vmpackc.low %vm117_vm7, %vm116_vm4  ;;  %661 = vmatprep.subr.bf16.mxu1 %v786_v1  ;;  %vm106_vm7 = vcmp.lt.s32.totalorder %v70_v20, %v846_v8 }
  0x35   :  { %vm118_vm12 = vmand %vm85_vm5, %vm102_vm6  ;;  %vm89_vm6 = vcmp.ge.s32.totalorder %v70_v20, %v840_v6 }
  0x36   :  { %vm119_vm15 = vmand %vm86_vm8, %vm103_vm9  ;;  %vm90_vm9 = vcmp.ge.s32.totalorder %v71_v21, %v840_v6 }
  0x37   :  { %639 = vmatpush3.bf16.msk.msra.mxu0 %vm891_vm10, %v789_v14  ;;  %vm908_vm4 = vmpackc.low %vm119_vm15, %vm118_vm12  ;;  %663 = vmatpush3.bf16.msk.msra.mxu1 %vm891_vm10, %v789_v14  ;;  %vm91_vm15 = vcmp.ge.s32.totalorder %v72_v23, %v840_v6 }
  0x38   :  { %640 = vmatprep.subr.bf16.mxu0 %v786_v1  ;;  %vm120_vm5 = vmand %vm87_vm13, %vm104_vm14  ;;  %664 = vmatprep.subr.bf16.mxu1 %v786_v1 }
  0x39   :  { %vm121_vm8 = vmand %vm88_vm1, %vm105_vm2  ;;  %vm108_vm1 = vcmp.lt.s32.totalorder %v72_v23, %v846_v8  ;;  %vm92_vm2 = vcmp.ge.s32.totalorder %v73_v24, %v840_v6 }
  0x3a   :  { %vm922_vm12 = vmpackc.low %vm121_vm8, %vm120_vm5  ;;  %vm109_vm5 = vcmp.lt.s32.totalorder %v73_v24, %v846_v8 }
  0x3b   :  { %642 = vmatpush3.bf16.msk.msra.mxu0 %vm908_vm4, %v789_v14  ;;  %vm122_vm13 = vmand %vm89_vm6, %vm106_vm7  ;;  %666 = vmatpush3.bf16.msk.msra.mxu1 %vm908_vm4, %v789_v14  ;;  %vm93_vm7 = vcmp.ge.s32.totalorder %v74_v26, %v840_v6 }
  0x3c   :  { %643 = vmatprep.subr.bf16.mxu0 %v786_v1  ;;  %vm123_vm14 = vmand %vm90_vm9, %vm107_vm0  ;;  %667 = vmatprep.subr.bf16.mxu1 %v786_v1  ;;  %vm110_vm9 = vcmp.lt.s32.totalorder %v74_v26, %v846_v8 }
  0x3d   :  { %vm939_vm8 = vmpackc.low %vm123_vm14, %vm122_vm13  ;;  %vm94_vm13 = vcmp.ge.s32.totalorder %v75_v28, %v840_v6  ;;  %vm111_vm14 = vcmp.lt.s32.totalorder %v75_v28, %v846_v8 }
  0x3e   :  { %vm124_vm0 = vmand %vm91_vm15, %vm108_vm1 }
  0x3f   :  { %645 = vmatpush3.bf16.msk.msra.mxu0 %vm922_vm12, %v789_v14  ;;  %vm125_vm6 = vmand %vm92_vm2, %vm109_vm5  ;;  %669 = vmatpush3.bf16.msk.msra.mxu1 %vm922_vm12, %v789_v14 }
  0x40   :  { %646 = vmatprep.subr.bf16.mxu0 %v786_v1  ;;  %670 = vmatprep.subr.bf16.mxu1 %v786_v1  ;;  %vm960_vm15 = vmpackc.low %vm125_vm6, %vm124_vm0  ;;  %vm1053_vm0 = vmmov 0  }
  0x41   :  { %vm126_vm1 = vmand %vm93_vm7, %vm110_vm9 }
  0x42   :  { %vm127_vm2 = vmand %vm94_vm13, %vm111_vm14 }
  0x43   :  { %648 = vmatpush3.bf16.msk.msra.mxu0 %vm939_vm8, %v789_v14  ;;  %672 = vmatpush3.bf16.msk.msra.mxu1 %vm939_vm8, %v789_v14  ;;  %vm973_vm5 = vmpackc.low %vm127_vm2, %vm126_vm1 }
  0x44   :  { %649 = vmatprep.subr.bf16.mxu0 %v786_v1  ;;  %673 = vmatprep.subr.bf16.mxu1 %v786_v1 }
  0x47   :  { %651 = vmatpush3.bf16.msk.msra.mxu0 %vm960_vm15, %v789_v14  ;;  %675 = vmatpush3.bf16.msk.msra.mxu1 %vm960_vm15, %v789_v14 }
  0x48   :  { %652 = vmatprep.subr.bf16.mxu0 %v786_v1  ;;  %676 = vmatprep.subr.bf16.mxu1 %v786_v1 }
  0x4b   :  { %654 = vmatpush3.bf16.msk.msra.mxu0 %vm973_vm5, %v789_v14  ;;  %678 = vmatpush3.bf16.msk.msra.mxu1 %vm973_vm5, %v789_v14 }
  0x4c   :  { %679 = vmatprep.subr.bf16.mxu0 %v786_v1 }
  0x4e   :  { %559 = vmatmul.mubr.f32.vlgmr.msra.gmra.mrb[0].mxu0 %v160_v33  ;;  %594 = vmatmul.mubr.f32.vlgmr.msra.gmra.mrb[0].mxu1 %v231_v34 }
  0x4f   :  { %681 = vmatpush3.bf16.msk.msra.mxu0 %vm859_vm11, %v789_v14  ;;  %628 = vmatprep.mubr.msk.f32.mxu0 %vm1053_vm0, %v787_v2  ;;  %vm379_vm11 = vcmask 31744  }
  0x50   :  { %682 = vmatprep.subr.bf16.mxu0 %v786_v1 }
  0x53   :  { %684 = vmatpush3.bf16.msk.msra.mxu0 %vm873_vm3, %v789_v14  ;;  %vm389_vm3 = vcmask 24576  }
  0x54   :  { %685 = vmatprep.subr.bf16.mxu0 %v786_v1 }
  0x57   :  { %687 = vmatpush3.bf16.msk.msra.mxu0 %vm891_vm10, %v789_v14 }
  0x58   :  { %688 = vmatprep.subr.bf16.mxu0 %v786_v1 }
  0x5b   :  { %690 = vmatpush3.bf16.msk.msra.mxu0 %vm908_vm4, %v789_v14 }
  0x5c   :  { %691 = vmatprep.subr.bf16.mxu0 %v786_v1 }
  0x5f   :  { %693 = vmatpush3.bf16.msk.msra.mxu0 %vm922_vm12, %v789_v14 }
  0x60   :  { %694 = vmatprep.subr.bf16.mxu0 %v786_v1 }
  0x63   :  { %696 = vmatpush3.bf16.msk.msra.mxu0 %vm939_vm8, %v789_v14 }
  0x64   :  { %697 = vmatprep.subr.bf16.mxu0 %v786_v1 }
  0x67   :  { %699 = vmatpush3.bf16.msk.msra.mxu0 %vm960_vm15, %v789_v14 }
  0x68   :  { %700 = vmatprep.subr.bf16.mxu0 %v786_v1 }
  0x6b   :  { %702 = vmatpush3.bf16.msk.msra.mxu0 %vm973_vm5, %v789_v14 }
  0x6e   :  { %629 = vmatmul.mubr.f32.vlgmr.msra.gmra.mrb[2].mxu0 %v302_v35 }
 0x121   :  { %v227_v36 = vpop.f32.mrb[0].mxu0  ;;  %v298_v38 = vpop.f32.mrb[0].mxu1 }
 0x122   :  { %v560_v37 = vpop.f32.mrb[1].mxu0  ;;  %v595_v39 = vpop.f32.mrb[1].mxu1  ;;  %v373_v40 = vmax.f32 %v298_v38, 1e-16 }
 0x141   :  { %v369_v41 = vpop.f32.mrb[2].mxu0 }
 0x142   :  { %v374_v42 = vmax.f32 %v369_v41, 1e-16  ;;  %v630_v43 = vpop.f32.mrb[3].mxu0 }
 0x144   :  { %v375_v44 = vmul.f32 %v374_v42, %v373_v40 }
 0x146   :  { %710 = vrsqrt.f32 %v375_v44 }
 0x150   :  { %v711_v45 = vpop.eup %710 }
 0x151   :  { %v377_v46 = vmul.f32 %v711_v45, %v227_v36 }
 0x153   :  { %v378_v47 = vmul.f32 %v377_v46, %v377_v46 }
 0x155   :  { %v380_v48 = vsel %vm379_vm11, %v378_v47, 0.0 }
 0x156   :  { %v381_v49 = vrot.slane %v380_v48, 4 }
 0x158   :  { %v382_v50 = vadd.f32 %v381_v49, %v380_v48 }
 0x15a   :  { %v383_v51 = vrot.slane %v382_v50, 2 }
 0x15c   :  { %v384_v52 = vadd.f32 %v383_v51, %v382_v50 }
 0x15e   :  { %v385_v53 = vrot.slane %v384_v52, 1 }
 0x160   :  { %v386_v55 = vadd.f32 %v385_v53, %v384_v52 }
 0x162   :  { %v388_v56 = vadd.f32 %v387_v54, %v386_v55 }
 0x164   :  { %390 = vst.msk [vmem:[#allocation7] sm:$0x1] %vm389_vm3, %v388_v56 }
 0x165   :  { %767 = shalt.err (!%p764_p6)
}
 0x166   :  { %s768_s8 = scalar_lea.hbm %s1035_s2, 128 }
 0x167   :  { %p769_p7 = scmp.ne.s32.totalorder %s1035_s2, %s768_s8  ;;  %p772_p8 = scmp.lt.u32.totalorder %s768_s8, %s1035_s2 }
 0x169   :  { %p774_p9 = pnand %p772_p8, %p769_p7 }
 0x16b   :  { %777 = shalt.err (!%p774_p9)
}
 0x16c   :  { %400 = dma.vmem_to_hbm [thread:$0]  %s398_s4, 128, %s1035_s2, [#allocation4]  }
 0x16d   :  { %782 = dma.done.wait [#allocation4], 128  }
 0x16e   :  { %783 = vsyncadd [#allocation4], 4294967168 }
 0x16f   :  { %404 = vsyncpa [#allocation3], 1 }
 0x170   :  { %405 = vsyncpa [#allocation6], 1 }
 0x171   :  { %406 = vsyncpa [#allocation4], 1 }

</bundles_post_ra>
